<compile_context>
chip_gen: v5e
topology: v5e:2x2
jax: 0.10.0
libtpu: 0.0.40
codegen_flags: <defaults>
</compile_context>

<pallas_src>
import jax
import jax.numpy as jnp
import numpy as np
from jax.experimental import pallas as pl
from jax.experimental.pallas import tpu as pltpu


def sasaki_kernel(p_ref, q_ref, bp_ref, w2_ref, out_ref):
    # p_ref, q_ref: (2n, TB); bp_ref: (n, TB); w2_ref: (2n, 1); out_ref: (1, TB)
    bp = bp_ref[...]
    # exact divide kept so the 1e-5 allclose vs the reference holds bit-tight
    conf = 1.0 / (1.0 + jnp.sum(bp * bp, axis=0, keepdims=True))          # (1, TB)
    # fused reduction: sum_i w2_i * p_i * q_i == w.(x*y) + w.(u*v)
    s = jnp.sum(w2_ref[...] * p_ref[...] * q_ref[...], axis=0, keepdims=True)
    out_ref[...] = s * conf


def _cdiv(a, b):
    return -(-a // b)


def _round_up(x, m):
    return ((x + m - 1) // m) * m


def _round_down(x, m):
    return (x // m) * m


def _chip_flavor():
    """Coarse chip-generation detection for tiling heuristics."""
    try:
        kind = jax.devices()[0].device_kind.lower()
    except Exception:  # pragma: no cover - be robust off-TPU
        kind = ""
    if "v7" in kind:
        return "v7x"
    if "v5 lite" in kind or "v5lite" in kind or "v5e" in kind:
        return "v5e"
    return "default"  # v6e-like settings


def _choose_tile(two_n, n, B, flavor):
    """Lane-tile as a function of bundle dim and per-generation VMEM budget."""
    if flavor == "v7x":
        budget, max_tile = 24 << 20, 32768       # 64 MiB physical / 32 MiB scoped
    elif flavor == "v5e":
        budget, max_tile = 12 << 20, 16384       # 16 MiB default scoped VMEM
    else:                                        # v6e & default
        budget, max_tile = 24 << 20, 32768
    # double-buffered per-lane bytes for p (2n), q (2n), bp (n), out (1), f32
    bytes_per_lane = 2 * (2 * two_n + n + 1) * 4
    tile = _round_down(budget // bytes_per_lane, 128)
    tile = max(128, min(tile, max_tile))
    # never use a tile larger than the batch needs (keeps tiny batches cheap)
    if B >= 128:
        tile = min(tile, max(128, _round_down(B, 128)))
    # v7x only: 2 TensorCores share "parallel" grid axes -> prefer a small EVEN
    # step count so both cores are busy and balanced.  On 1-TC chips (v5e/v6e)
    # the grid is a serial loop, so we never shrink the tile there.
    if flavor == "v7x" and B >= 256:
        steps = _cdiv(B, tile)
        if steps % 2 == 1 and steps <= 7:
            tile = max(128, _round_up(_cdiv(B, steps + 1), 128))
    return tile


def sasaki_metric_forward(p, q, base_point, w):
    """p, q: (2n, B) f32; base_point: (2n, B) or (n, B) f32; w: (n, 1) f32 -> (B,) f32."""
    two_n, B = p.shape
    assert two_n % 2 == 0, "bundle dimension (leading axis of p) must be even"
    n = two_n // 2
    assert q.shape == (two_n, B)
    assert w.shape == (n, 1)
    assert base_point.shape[1] == B and base_point.shape[0] in (n, two_n)

    # Only the first n rows of base_point are ever used.  If its leading dim is
    # 2n but n is not sublane-aligned, slice in the wrapper; otherwise let the
    # (n, tile) BlockSpec read only the first n rows (no wasted HBM traffic).
    if base_point.shape[0] == two_n and n % 8 != 0:
        base_point = base_point[:n]

    # Duplicated weights so both halves reduce in a single pass.
    w2 = jnp.concatenate([w, w], axis=0)  # (2n, 1)

    flavor = _chip_flavor()
    tile = _choose_tile(two_n, n, B, flavor)
    grid = (_cdiv(B, tile),)  # partial final block handled by the pipeline

    # Cover the double-buffered working set (+ headroom), per generation.
    vmem_limit = int(2 * (2 * two_n + n + 1) * tile * 4 + 4 * two_n * 4 + (2 << 20))
    vmem_limit = max(vmem_limit, 16 << 20)
    vmem_limit = min(vmem_limit, (48 << 20) if flavor == "v7x" else (96 << 20))

    cost = pl.CostEstimate(
        flops=int(B) * (3 * two_n + 2 * n + 3),
        transcendentals=0,
        bytes_accessed=int(B) * 4 * (2 * two_n + n + 1) + 2 * two_n * 4,
    )

    out = pl.pallas_call(
        sasaki_kernel,
        out_shape=jax.ShapeDtypeStruct((1, B), jnp.float32),
        grid_spec=pltpu.PrefetchScalarGridSpec(
            num_scalar_prefetch=0,
            grid=grid,
            in_specs=[
                pl.BlockSpec((two_n, tile), lambda b: (0, b)),
                pl.BlockSpec((two_n, tile), lambda b: (0, b)),
                pl.BlockSpec((n, tile), lambda b: (0, b)),   # first n rows only
                pl.BlockSpec((two_n, 1), lambda b: (0, 0)),
            ],
            out_specs=pl.BlockSpec((1, tile), lambda b: (0, b)),
        ),
        compiler_params=pltpu.CompilerParams(
            dimension_semantics=("parallel",),
            vmem_limit_bytes=vmem_limit,
        ),
        cost_estimate=cost,
    )(p, q, base_point, w2)
    return out.reshape(B)


def sasaki_metric_reference(p, q, base_point, w):
    """Pure-JAX reference mirroring the PyTorch forward."""
    two_n = p.shape[0]
    n = two_n // 2
    x, v = p[:n], p[n:]
    y, u = q[:n], q[n:]
    bp = base_point[:n] if base_point.shape[0] == two_n else base_point

    def base_metric(a, b):
        conf = 1.0 / (1.0 + jnp.sum(bp * bp, axis=0))
        return jnp.sum(w * a * b, axis=0) * conf

    return base_metric(x, y) + base_metric(u, v)


if __name__ == "__main__":
    n = 8            # base-manifold dimension -> tangent bundle dim = 2n = 16
    key = jax.random.PRNGKey(0)

    # deterministic "parameters" of the synthetic base metric
    w = (1.0 + 0.1 * jnp.arange(n, dtype=jnp.float32)).reshape(n, 1)

    # B = 256: lane-aligned batch; B = 200: exercises the no-pad partial block.
    for B in (256, 200):
        kp, kq, kb = jax.random.split(jax.random.fold_in(key, B), 3)
        p = jax.random.normal(kp, (2 * n, B), dtype=jnp.float32)
        q = jax.random.normal(kq, (2 * n, B), dtype=jnp.float32)
        base_point = jax.random.normal(kb, (2 * n, B), dtype=jnp.float32)

        out = jax.block_until_ready(sasaki_metric_forward(p, q, base_point, w))
        ref = sasaki_metric_reference(p, q, base_point, w)
        np.testing.assert_allclose(np.asarray(out), np.asarray(ref),
                                   rtol=1e-5, atol=1e-5)

    # TODO(synk): get_metric_tensor / get_christoffels (autograd-based) are not
    # part of the forward pass and are not translated.
    print("KERNEL_OK")
</pallas_src>

<mosaic_0001>
module attributes {stable_mosaic.version = 11 : i64} {
  func.func @sasaki_kernel(%arg0: i32, %arg1: memref<16x256xf32, #tpu.memory_space<vmem>>, %arg2: memref<16x256xf32, #tpu.memory_space<vmem>>, %arg3: memref<8x256xf32, #tpu.memory_space<vmem>>, %arg4: memref<16x1xf32, #tpu.memory_space<vmem>>, %arg5: memref<1x256xf32, #tpu.memory_space<vmem>>) attributes {dimension_semantics = [#tpu.dimension_semantics<parallel>], iteration_bounds = array<i64: 1>, scalar_prefetch = 0 : i64, scratch_operands = 0 : i64, tpu.core_type = #tpu.core_type<tc>, window_params = [{transform_indices = @transform_0, window_bounds = array<i64: 16, 256>}, {transform_indices = @transform_1, window_bounds = array<i64: 16, 256>}, {transform_indices = @transform_2, window_bounds = array<i64: 8, 256>}, {pipeline_mode = #tpu.pipeline_mode<synchronous>, transform_indices = @transform_3, window_bounds = array<i64: 16, 1>}, {transform_indices = @transform_4, window_bounds = array<i64: 1, 256>}]} {
    %c0 = arith.constant 0 : index
    %c0_0 = arith.constant 0 : index
    %0 = vector.load %arg3[%c0, %c0_0] : memref<8x256xf32, #tpu.memory_space<vmem>>, vector<8x256xf32>
    %1 = arith.mulf %0, %0 : vector<8x256xf32>
    %cst = arith.constant dense<0.000000e+00> : vector<256xf32>
    %2 = vector.multi_reduction <add>, %1, %cst [0] : vector<8x256xf32> to vector<256xf32>
    %3 = vector.shape_cast %2 : vector<256xf32> to vector<1x256xf32>
    %cst_1 = arith.constant 1.000000e+00 : f32
    %4 = vector.broadcast %cst_1 : f32 to vector<1x256xf32>
    %5 = arith.addf %4, %3 : vector<1x256xf32>
    %cst_2 = arith.constant 1.000000e+00 : f32
    %6 = vector.broadcast %cst_2 : f32 to vector<1x256xf32>
    %7 = arith.divf %6, %5 : vector<1x256xf32>
    %c0_3 = arith.constant 0 : index
    %c0_4 = arith.constant 0 : index
    %8 = vector.load %arg4[%c0_3, %c0_4] : memref<16x1xf32, #tpu.memory_space<vmem>>, vector<16x1xf32>
    %c0_5 = arith.constant 0 : index
    %c0_6 = arith.constant 0 : index
    %9 = vector.load %arg1[%c0_5, %c0_6] : memref<16x256xf32, #tpu.memory_space<vmem>>, vector<16x256xf32>
    %10 = vector.broadcast %8 : vector<16x1xf32> to vector<16x256xf32>
    %11 = arith.mulf %10, %9 : vector<16x256xf32>
    %c0_7 = arith.constant 0 : index
    %c0_8 = arith.constant 0 : index
    %12 = vector.load %arg2[%c0_7, %c0_8] : memref<16x256xf32, #tpu.memory_space<vmem>>, vector<16x256xf32>
    %13 = arith.mulf %11, %12 : vector<16x256xf32>
    %cst_9 = arith.constant dense<0.000000e+00> : vector<256xf32>
    %14 = vector.multi_reduction <add>, %13, %cst_9 [0] : vector<16x256xf32> to vector<256xf32>
    %15 = vector.shape_cast %14 : vector<256xf32> to vector<1x256xf32>
    %16 = arith.mulf %15, %7 : vector<1x256xf32>
    %c0_10 = arith.constant 0 : index
    %c0_11 = arith.constant 0 : index
    %17 = vector.load %arg5[%c0_10, %c0_11] : memref<1x256xf32, #tpu.memory_space<vmem>>, vector<1x256xf32>
    tpu.vector_store %arg5[%c0_10, %c0_11], %16 {strides = array<i32>} : memref<1x256xf32, #tpu.memory_space<vmem>>, vector<1x256xf32>,
    return
  }
  func.func @transform_0(%arg0: i32) -> (i32, i32) {
    %c0_i32 = arith.constant 0 : i32
    %c0_i32_0 = arith.constant 0 : i32
    return %c0_i32, %arg0 : i32, i32
  }
  func.func @transform_1(%arg0: i32) -> (i32, i32) {
    %c0_i32 = arith.constant 0 : i32
    %c0_i32_0 = arith.constant 0 : i32
    return %c0_i32, %arg0 : i32, i32
  }
  func.func @transform_2(%arg0: i32) -> (i32, i32) {
    %c0_i32 = arith.constant 0 : i32
    %c0_i32_0 = arith.constant 0 : i32
    return %c0_i32, %arg0 : i32, i32
  }
  func.func @transform_3(%arg0: i32) -> (i32, i32) {
    %c0_i32 = arith.constant 0 : i32
    %c0_i32_0 = arith.constant 0 : i32
    %c0_i32_1 = arith.constant 0 : i32
    return %c0_i32, %c0_i32_0 : i32, i32
  }
  func.func @transform_4(%arg0: i32) -> (i32, i32) {
    %c0_i32 = arith.constant 0 : i32
    %c0_i32_0 = arith.constant 0 : i32
    return %c0_i32, %arg0 : i32, i32
  }
}

</mosaic_0001>

<bundles_post_ra>
// kernel: tpu_custom_call.1
= control target key start
LH: loop header
LB: loop body
LE: loop exit
PB: predicated region body
PF: predicated region fallthrough
CT: control target
= control target key end

     0   :  { %9 = vsyncpa [#allocation3], 0  ;;  %s360_s0 = inlined_call_operand.hbm [shape: f32[16,256], index: 0, kind: input, shape index: {}]   ;;  %s361_s1 = inlined_call_operand.hbm [shape: f32[16,256], index: 1, kind: input, shape index: {}]   ;;  %s362_s2 = inlined_call_operand.hbm [shape: f32[16,256], index: 2, kind: input, shape index: {}]   ;;  %s363_s3 = inlined_call_operand.vmem [shape: f32[16,1], index: 3, kind: input, shape index: {}]   ;;  %s364_s4 = inlined_call_operand.hbm [shape: f32[1,256], index: 4, kind: output, shape index: {}]  }
   0x1   :  { %10 = vsyncpa [#allocation6], 0 }
   0x2   :  { %11 = vsyncpa [#allocation4], 0  ;;  %s29_s17 = sshll.u32 %s361_s1, 4  ;;  %s298_s18 = smov [#allocation5]   ;;  %s30_s17 = int_to_ptr.hbm [resolvable:$true] %s29_s17 }
   0x3   :  { %s31_s19 = sshll.u32 %s298_s18, 4  ;;  %s16_s22 = sshll.u32 %s360_s0, 4  ;;  %s32_s19 = int_to_ptr.vmem [resolvable:$true] %s31_s19  ;;  %s17_s22 = int_to_ptr.hbm [resolvable:$true] %s16_s22 }
   0x4   :  { %s299_s23 = smov 256   ;;  %s300_s24 = smov 16  }
   0x5   :  { %37 = dma.hbm_to_vmem [thread:$0]  %s30_s17, 512, %s32_s19, [#allocation6], %s299_s23, %s299_s23, %s300_s24  }
   0x6   :  { %s301_s25 = smov [#allocation2]   ;;  %s43_s29 = sshll.u32 %s362_s2, 4  ;;  %s44_s29 = int_to_ptr.hbm [resolvable:$true] %s43_s29 }
   0x7   :  { %s18_s26 = sshll.u32 %s301_s25, 4  ;;  %s302_s1 = smov [#allocation7]   ;;  %s19_s26 = int_to_ptr.vmem [resolvable:$true] %s18_s26 }
   0x8   :  { %24 = dma.hbm_to_vmem [thread:$0]  %s17_s22, 512, %s19_s26, [#allocation3], %s299_s23, %s299_s23, %s300_s24  }
   0x9   :  { %s45_s30 = sshll.u32 %s302_s1, 4  ;;  %s46_s30 = int_to_ptr.vmem [resolvable:$true] %s45_s30 }
   0xa   :  { %48 = dma.hbm_to_vmem [thread:$0]  %s44_s29, 256, %s46_s30, [#allocation6]  }
   0xb   :  { %292 = dma.done.wait [#allocation3], 512  }
   0xc   :  { %293 = vsyncadd [#allocation3], 4294966784 }
   0xd   :  { %294 = dma.done.wait [#allocation6], 768  }
   0xe   :  { %295 = vsyncadd [#allocation6], 4294966528  ;;  %v303_v0 = vmov 0   ;;  %v111_v1 = vld [vmem:[%s363_s3] sm:$0xff]  ;;  %v112_v2 = vld [vmem:[%s363_s3 + $0x8] sm:$0xff]  ;;  %s304_s3 = smov [#allocation8]  }
   0xf   :  { %191 = vset.pattern.permute.xlu0 %v303_v0  ;;  %v64_v3 = vld [vmem:[#allocation7 + $0x8] sm:$0xff]  ;;  %v63_v4 = vld [vmem:[#allocation7] sm:$0xff]  ;;  %v115_v27 = vld [vmem:[#allocation2 + $0x10] sm:$0xff]  ;;  %s171_s7 = sshll.u32 %s304_s3, 4  ;;  %s173_s10 = sshll.u32 %s364_s4, 4  ;;  %vm158_vm8 = vcmask 1040384   ;;  %s172_s7 = int_to_ptr.vmem [resolvable:$true] %s171_s7  ;;  %s174_s10 = int_to_ptr.hbm [resolvable:$true] %s173_s10 }
  0x10   :  { %119 = vperm.xlu0 %191, %v111_v1   ;;  %v66_v5 = vmul.f32 %v64_v3, %v64_v3  ;;  %v65_v6 = vmul.f32 %v63_v4, %v63_v4  ;;  %v113_v24 = vld [vmem:[#allocation2] sm:$0xff]  ;;  %v114_v25 = vld [vmem:[#allocation2 + $0x8] sm:$0xff]  ;;  %v116_v28 = vld [vmem:[#allocation2 + $0x18] sm:$0xff] }
  0x11   :  { %v131_v30 = vld [vmem:[#allocation5] sm:$0xff]  ;;  %v132_v33 = vld [vmem:[#allocation5 + $0x8] sm:$0xff]  ;;  %v133_v34 = vld [vmem:[#allocation5 + $0x10] sm:$0xff] }
  0x12   :  { %v73_v7 = vrot.slane %v66_v5, 4  ;;  %v67_v8 = vrot.slane %v65_v6, 4  ;;  %v134_v35 = vld [vmem:[#allocation5 + $0x18] sm:$0xff] }
  0x14   :  { %v74_v9 = vadd.f32 %v73_v7, %v66_v5  ;;  %v68_v10 = vadd.f32 %v67_v8, %v65_v6 }
  0x16   :  { %v75_v11 = vrot.slane %v74_v9, 2  ;;  %v69_v12 = vrot.slane %v68_v10, 2 }
  0x18   :  { %124 = vperm.xlu0 %191, %v112_v2   ;;  %v76_v13 = vadd.f32 %v75_v11, %v74_v9  ;;  %v70_v14 = vadd.f32 %v69_v12, %v68_v10  ;;  %v161_v10 = vlaneseq }
  0x1a   :  { %v77_v15 = vrot.slane %v76_v13, 1  ;;  %v71_v16 = vrot.slane %v70_v14, 1  ;;  %vm163_vm9 = vcmp.lt.s32.totalorder %v161_v10, 256 }
  0x1c   :  { %v78_v17 = vadd.f32 %v77_v15, %v76_v13  ;;  %v72_v18 = vadd.f32 %v71_v16, %v70_v14 }
  0x1e   :  { %v80_v19 = vadd.f32 1.0, %v78_v17  ;;  %v79_v20 = vadd.f32 1.0, %v72_v18 }
  0x20   :  { %192 = vrcp.f32 %v80_v19  ;;  %vm101_vm0 = vweird.f32 %v80_v19  ;;  %vm86_vm2 = vweird.f32 %v79_v20  ;;  %v107_v51 = vand.u32 2147483648, %v80_v19 }
  0x21   :  { %194 = vrcp.f32 %v79_v20  ;;  %v105_v55 = vand.u32 2147483647, %v80_v19  ;;  %v92_v56 = vand.u32 2147483648, %v79_v20  ;;  %v90_v61 = vand.u32 2147483647, %v79_v20 }
  0x22   :  { %v108_v63 = vor.u32 1.1754944e-38, %v107_v51 }
  0x23   :  { %vm106_vm6 = vcmp.eq.f32.partialorder %v105_v55, 8.507059e+37  ;;  %v93_v3 = vor.u32 1.1754944e-38, %v92_v56  ;;  %vm91_vm7 = vcmp.eq.f32.partialorder %v90_v61, 8.507059e+37 }
  0x26   :  { %v193_v22 = vpop.eup %192 }
  0x27   :  { %v195_v23 = vpop.eup %194  ;;  %v97_v26 = vmul.f32 %v193_v22, %v80_v19  ;;  %vm102_vm1 = vweird.f32 %v193_v22 }
  0x28   :  { %v82_v29 = vmul.f32 %v195_v23, %v79_v20  ;;  %vm87_vm3 = vweird.f32 %v195_v23  ;;  %vm345_vm4 = vmor %vm101_vm0, %vm102_vm1 }
  0x29   :  { %v98_v39 = vsub.f32 1.0, %v97_v26  ;;  %vm349_vm5 = vmor %vm86_vm2, %vm87_vm3 }
  0x2a   :  { %v83_v40 = vsub.f32 1.0, %v82_v29 }
  0x2b   :  { %v99_v47 = vmul.f32 %v193_v22, %v98_v39 }
  0x2c   :  { %v84_v48 = vmul.f32 %v195_v23, %v83_v40 }
  0x2d   :  { %v100_v54 = vadd.f32 %v193_v22, %v99_v47 }
  0x2e   :  { %v85_v60 = vadd.f32 %v195_v23, %v84_v48 }
  0x2f   :  { %v104_v2 = vsel %vm345_vm4, %v193_v22, %v100_v54 }
  0x30   :  { %v89_v6 = vsel %vm349_vm5, %v195_v23, %v85_v60  ;;  %v109_v7 = vsel %vm106_vm6, %v108_v63, %v104_v2 }
  0x31   :  { %v94_v11 = vsel %vm91_vm7, %v93_v3, %v89_v6 }
  0x82   :  { %v120_v21 = vpop.permute.xlu0 %119 }
  0x83   :  { %v127_v31 = vmul.f32 %v120_v21, %v113_v24  ;;  %v128_v32 = vmul.f32 %v120_v21, %v114_v25 }
  0x85   :  { %v135_v41 = vmul.f32 %v131_v30, %v127_v31  ;;  %v136_v42 = vmul.f32 %v132_v33, %v128_v32 }
  0x8a   :  { %v125_v36 = vpop.permute.xlu0 %124 }
  0x8b   :  { %v129_v37 = vmul.f32 %v125_v36, %v115_v27  ;;  %v130_v38 = vmul.f32 %v125_v36, %v116_v28 }
  0x8d   :  { %v137_v43 = vmul.f32 %v133_v34, %v129_v37  ;;  %v138_v44 = vmul.f32 %v134_v35, %v130_v38 }
  0x8f   :  { %v139_v45 = vadd.f32 %v137_v43, %v135_v41  ;;  %v146_v46 = vadd.f32 %v138_v44, %v136_v42 }
  0x91   :  { %v140_v49 = vrot.slane %v139_v45, 4  ;;  %v147_v50 = vrot.slane %v146_v46, 4 }
  0x93   :  { %v141_v52 = vadd.f32 %v140_v49, %v139_v45  ;;  %v148_v53 = vadd.f32 %v147_v50, %v146_v46 }
  0x95   :  { %v142_v58 = vrot.slane %v141_v52, 2  ;;  %v149_v59 = vrot.slane %v148_v53, 2 }
  0x97   :  { %v143_v0 = vadd.f32 %v142_v58, %v141_v52  ;;  %v150_v1 = vadd.f32 %v149_v59, %v148_v53 }
  0x99   :  { %v144_v4 = vrot.slane %v143_v0, 1  ;;  %v151_v5 = vrot.slane %v150_v1, 1 }
  0x9b   :  { %v145_v8 = vadd.f32 %v144_v4, %v143_v0  ;;  %v152_v9 = vadd.f32 %v151_v5, %v150_v1 }
  0x9d   :  { %v154_v12 = vmul.f32 %v152_v9, %v109_v7  ;;  %v153_v13 = vmul.f32 %v145_v8, %v94_v11 }
  0x9f   :  { %v157_v14 = vrot.slane %v154_v12, 7 }
  0xa1   :  { %v159_v15 = vsel %vm158_vm8, %v153_v13, %v157_v14 }
  0xa2   :  { %165 = vst.msk [vmem:[#allocation8] sm:$0x3] %vm163_vm9, %v159_v15 }
  0xa3   :  { %176 = dma.vmem_to_hbm [thread:$0]  %s172_s7, 32, %s174_s10, [#allocation4]  }
  0xa4   :  { %296 = dma.done.wait [#allocation4], 32  }
  0xa5   :  { %297 = vsyncadd [#allocation4], 4294967264 }
  0xa6   :  { %181 = vsyncpa [#allocation3], 1 }
  0xa7   :  { %182 = vsyncpa [#allocation6], 1 }
  0xa8   :  { %183 = vsyncpa [#allocation4], 1 }

</bundles_post_ra>
